<compile_context>
chip_gen: v7x
topology: tpu7x:2x2x1
jax: 0.10.0
libtpu: 0.0.40
codegen_flags: <defaults>
</compile_context>

<pallas_src>
import functools

import jax
import jax.numpy as jnp
from jax.experimental import pallas as pl
from jax.experimental.pallas import tpu as pltpu


def _round_up(x, m):
    return ((x + m - 1) // m) * m


def _cdiv(a, b):
    return (a + b - 1) // b


_VMEM_LIMIT = 32 * 1024 * 1024          # explicit scoped-VMEM request
_BLOCK_BUDGET = 6 * 1024 * 1024         # per-step (single-buffer) byte budget


# ---------------------------------------------------------------------------
# Fused path: memory bank resident in VMEM, gather done inside the kernel.
# ---------------------------------------------------------------------------
def _fused_kernel(mem_ref, idx_ref, x_ref, o_ref, *, inv_T, use_softmax):
    # mem_ref: (F, nOut)  whole (transposed) memory bank, same block every step
    # idx_ref: (tb, K+1)  int32 negative+positive sample indices
    # x_ref  : (tb, F)    anchors
    # o_ref  : (tb, K+1)  scores
    x = x_ref[...]
    mem = mem_ref[...]
    idx = idx_ref[...]
    tb, kp1 = idx.shape
    n_out = mem.shape[1]

    # Scores against every bank row on the (otherwise idle) MXU.  HIGHEST
    # precision keeps f32 accuracy; the kernel is HBM-bound so the extra MXU
    # passes are free.
    s_all = jnp.dot(x, mem, precision=jax.lax.Precision.HIGHEST,
                    preferred_element_type=jnp.float32)          # (tb, nOut)

    # Exact one-hot selection of the K+1 requested rows (pure VPU/XLU).
    o_iota = jax.lax.broadcasted_iota(jnp.int32, (tb, kp1, n_out), 2)
    sel = o_iota == idx[:, :, None]                              # (tb,K+1,nOut)
    scores = jnp.sum(jnp.where(sel, s_all[:, None, :], 0.0), axis=-1)
    scores = scores * inv_T
    if not use_softmax:
        scores = jnp.exp(scores)
    o_ref[...] = scores.astype(o_ref.dtype)


def _fused_scores(memory, idx, x, *, T, use_softmax, block_batch=None):
    batch, F = x.shape
    kp1 = idx.shape[1]
    n_out = memory.shape[0]

    if block_batch is None:
        f_l = _round_up(F, 128)
        k_l = _round_up(kp1, 128)
        o_l = _round_up(n_out, 128)
        # x + idx + out blocks, one s_all row, ~3 one-hot temporaries per group.
        per_group = 4 * (f_l + 2 * k_l + o_l + 3 * kp1 * o_l)
        tb = max(8, min(1024, _BLOCK_BUDGET // max(per_group, 1)))
    else:
        tb = int(block_batch)

    # v7x megacore: guarantee >=2 grid steps when the batch is big enough.
    if batch >= 16:
        tb = min(tb, _round_up(_cdiv(batch, 2), 8))

    if tb >= batch:
        tb, padded = batch, batch               # single full-extent tile
    else:
        tb = max(8, (tb // 8) * 8)              # sublane alignment
        padded = _round_up(batch, tb)

    if padded != batch:                         # pad only the SMALL arrays
        pad = padded - batch
        x = jnp.pad(x, ((0, pad), (0, 0)))
        idx = jnp.pad(idx, ((0, pad), (0, 0)))

    mem_t = memory.T                            # (F, nOut), tiny XLA transpose

    kernel = functools.partial(_fused_kernel, inv_T=1.0 / T,
                               use_softmax=use_softmax)
    out = pl.pallas_call(
        kernel,
        out_shape=jax.ShapeDtypeStruct((padded, kp1), jnp.float32),
        grid=(padded // tb,),
        in_specs=[pl.BlockSpec((F, n_out), lambda i: (0, 0)),   # bank: fetched once
                  pl.BlockSpec((tb, kp1), lambda i: (i, 0)),
                  pl.BlockSpec((tb, F), lambda i: (i, 0))],
        out_specs=pl.BlockSpec((tb, kp1), lambda i: (i, 0)),
        compiler_params=pltpu.CompilerParams(
            dimension_semantics=("parallel",),
            vmem_limit_bytes=_VMEM_LIMIT),
    )(mem_t, idx, x)
    return out[:batch]


# ---------------------------------------------------------------------------
# Fallback path: XLA gather (large bank), K-tiled Pallas scoring kernel.
# ---------------------------------------------------------------------------
def _gathered_kernel(w_ref, x_ref, o_ref, *, inv_T, use_softmax):
    # w_ref: (tb, tk, F) gathered memory rows;  x_ref: (tb, F);  o_ref: (tb, tk)
    w = w_ref[...]
    x = x_ref[...]
    # Single broadcast multiply + single lane reduce (exact f32, no per-k loop).
    scores = jnp.sum(w * x[:, None, :], axis=-1) * inv_T
    if not use_softmax:
        scores = jnp.exp(scores)
    o_ref[...] = scores.astype(o_ref.dtype)


def _gathered_scores(memory, idx, x, *, T, use_softmax,
                     block_batch=None, block_k=None):
    batch, F = x.shape
    kp1 = idx.shape[1]
    f_l = _round_up(F, 128)                     # VMEM lane padding of the F axis

    # K tiling: keep the whole K+1 axis only if an 8-row block fits the budget,
    # otherwise tile K+1 in 128-wide chunks (out-block lane constraint).
    if block_k is None:
        per_group_full = 4 * (kp1 * f_l + f_l + _round_up(kp1, 128))
        tk = kp1 if 8 * per_group_full <= _BLOCK_BUDGET else 128
    else:
        tk = int(block_k)
    if tk >= kp1:
        tk, kp1p = kp1, kp1                     # no K tiling
    else:
        tk = max(128, (tk // 128) * 128)
        kp1p = _round_up(kp1, tk)

    per_group = 4 * (tk * f_l + f_l + _round_up(tk, 128))
    if block_batch is None:
        tb = max(8, min(1024, _BLOCK_BUDGET // max(per_group, 1)))
    else:
        tb = int(block_batch)
    if batch >= 16:                             # v7x megacore: >=2 grid steps
        tb = min(tb, _round_up(_cdiv(batch, 2), 8))
    if tb >= batch:
        tb, padded = batch, batch
    else:
        tb = max(8, (tb // 8) * 8)
        padded = _round_up(batch, tb)

    # Pad the SMALL idx/x before the gather so the big gathered tensor is
    # produced already padded (no jnp.pad copy of the dominant array).
    if padded != batch:
        pad = padded - batch
        x = jnp.pad(x, ((0, pad), (0, 0)))
        idx = jnp.pad(idx, ((0, pad), (0, 0)))
    if kp1p != kp1:
        idx = jnp.pad(idx, ((0, 0), (0, kp1p - kp1)))   # index 0 is a valid row

    # TODO(synk): for very large banks, replace this XLA gather with a manual
    # HBM DMA-gather (memory_space=pl.ANY + scalar-prefetched idx) to remove
    # the extra HBM write+read of `weight`.
    weight = jnp.take(memory, idx.reshape(-1), axis=0).reshape(padded, kp1p, F)

    kernel = functools.partial(_gathered_kernel, inv_T=1.0 / T,
                               use_softmax=use_softmax)
    out = pl.pallas_call(
        kernel,
        out_shape=jax.ShapeDtypeStruct((padded, kp1p), jnp.float32),
        grid=(padded // tb, kp1p // tk),
        in_specs=[pl.BlockSpec((tb, tk, F), lambda i, j: (i, j, 0)),
                  pl.BlockSpec((tb, F), lambda i, j: (i, 0))],
        out_specs=pl.BlockSpec((tb, tk), lambda i, j: (i, j)),
        compiler_params=pltpu.CompilerParams(
            dimension_semantics=("parallel", "parallel"),
            vmem_limit_bytes=_VMEM_LIMIT),
    )(weight, x)
    return out[:batch, :kp1]


# ---------------------------------------------------------------------------
# Functional forward of MemoryInsDis.
# ---------------------------------------------------------------------------
def memory_ins_dis_forward(x, y, idx, memory, *, K, T=0.07, Z=-1.0,
                           momentum=0.5, use_softmax=False,
                           block_batch=None, block_k=None,
                           max_vmem_bank_bytes=2 * 1024 * 1024):
    """Returns (out, new_memory, new_Z).

    NOTE: `memory` and Z (params[2]) are PyTorch register_buffers mutated in
    place; here the updated values are returned and must be threaded back by
    the caller.  Z must be threaded back as a *host-side Python float*
    (matching PyTorch's .item()); a traced Z would break the `if Z < 0` branch.
    """
    batch, F = x.shape
    outputSize = memory.shape[0]
    idx = idx.reshape(batch, K + 1).astype(jnp.int32)

    bank_bytes = outputSize * _round_up(F, 128) * 4
    if bank_bytes <= max_vmem_bank_bytes:
        out = _fused_scores(memory, idx, x, T=T, use_softmax=use_softmax,
                            block_batch=block_batch)
    else:
        out = _gathered_scores(memory, idx, x, T=T, use_softmax=use_softmax,
                               block_batch=block_batch, block_k=block_k)

    new_Z = Z
    if not use_softmax:
        if Z < 0:                              # first call sets params[2]
            # Computed on the *sliced* (un-padded) out, so padded rows never
            # contaminate the normalization constant.
            new_Z = jnp.mean(out) * outputSize
        out = out / new_Z

    # no_grad memory update (momentum blend + L2 renorm + index_copy_) — glue.
    w_pos = jnp.take(memory, y, axis=0) * momentum + x * (1.0 - momentum)
    w_pos = w_pos / jnp.sqrt(jnp.sum(w_pos * w_pos, axis=1, keepdims=True))
    new_memory = memory.at[y].set(w_pos)

    return out, new_memory, new_Z


# ---------------------------------------------------------------------------
# Pure-JAX reference (mirrors the PyTorch module).
# ---------------------------------------------------------------------------
def _reference(x, y, idx, memory, *, K, T, Z, momentum, use_softmax):
    batch, F = x.shape
    outputSize = memory.shape[0]
    weight = memory[idx.reshape(-1)].reshape(batch, K + 1, F)
    out = jnp.sum(weight * x[:, None, :], axis=-1)
    new_Z = Z
    if use_softmax:
        out = out / T
    else:
        out = jnp.exp(out / T)
        if Z < 0:
            new_Z = jnp.mean(out) * outputSize
        out = out / new_Z
    w_pos = memory[y] * momentum + x * (1.0 - momentum)
    w_pos = w_pos / jnp.sqrt(jnp.sum(w_pos * w_pos, axis=1, keepdims=True))
    new_memory = memory.at[y].set(w_pos)
    return out, new_memory, new_Z


if __name__ == "__main__":
    inputSize, outputSize, T, momentum = 32, 100, 0.07, 0.5

    key = jax.random.PRNGKey(0)
    k1, k2, k3, k4, k5, k6 = jax.random.split(key, 6)
    stdv = 1.0 / (inputSize / 3.0) ** 0.5
    memory = jax.random.uniform(k1, (outputSize, inputSize), jnp.float32,
                                minval=-stdv, maxval=stdv)

    # ---- test 1: fused path, NCE (use_softmax=False), single-tile grid ----
    K = 6
    batch = 4
    x = jax.random.normal(k2, (batch, inputSize), dtype=jnp.float32)
    x = x / jnp.linalg.norm(x, axis=-1, keepdims=True)
    y = jnp.arange(batch, dtype=jnp.int32)
    idx = jax.random.randint(k3, (batch, K + 1), 0, outputSize, dtype=jnp.int32)
    idx = idx.at[:, 0].set(y)                 # idx.select(1, 0).copy_(y)

    out, mem_new, _ = memory_ins_dis_forward(
        x, y, idx, memory, K=K, T=T, Z=-1.0, momentum=momentum,
        use_softmax=False)
    out = jax.block_until_ready(out)
    ref, ref_mem, _ = _reference(x, y, idx, memory, K=K, T=T, Z=-1.0,
                                 momentum=momentum, use_softmax=False)
    assert out.shape == (batch, K + 1)
    assert jnp.allclose(out, ref, rtol=5e-4, atol=1e-10)
    assert jnp.allclose(mem_new, ref_mem, rtol=1e-5, atol=1e-6)

    # ---- test 2: fused path, softmax logits, multi-tile grid + batch pad ----
    batch2 = 20
    x2 = jax.random.normal(k4, (batch2, inputSize), dtype=jnp.float32)
    x2 = x2 / jnp.linalg.norm(x2, axis=-1, keepdims=True)
    y2 = jnp.arange(batch2, dtype=jnp.int32)
    idx2 = jax.random.randint(k5, (batch2, K + 1), 0, outputSize,
                              dtype=jnp.int32)
    idx2 = idx2.at[:, 0].set(y2)
    out2, _, _ = memory_ins_dis_forward(
        x2, y2, idx2, memory, K=K, T=T, Z=-1.0, momentum=momentum,
        use_softmax=True, block_batch=8)       # grid=3, padded batch
    out2 = jax.block_until_ready(out2)
    ref2, _, _ = _reference(x2, y2, idx2, memory, K=K, T=T, Z=-1.0,
                            momentum=momentum, use_softmax=True)
    assert out2.shape == (batch2, K + 1)
    assert jnp.allclose(out2, ref2, rtol=5e-4, atol=1e-4)

    # ---- test 3: fallback path (forced), K-tiled grid + batch pad ----------
    K3 = 255                                   # K+1 = 256 -> two 128-wide K tiles
    batch3 = 20
    x3 = jax.random.normal(k6, (batch3, inputSize), dtype=jnp.float32)
    x3 = x3 / jnp.linalg.norm(x3, axis=-1, keepdims=True)
    y3 = jnp.arange(batch3, dtype=jnp.int32)
    idx3 = jax.random.randint(jax.random.PRNGKey(1), (batch3, K3 + 1), 0,
                              outputSize, dtype=jnp.int32)
    idx3 = idx3.at[:, 0].set(y3)
    out3, _, _ = memory_ins_dis_forward(
        x3, y3, idx3, memory, K=K3, T=T, Z=-1.0, momentum=momentum,
        use_softmax=False, block_batch=8, block_k=128,
        max_vmem_bank_bytes=0)                 # force XLA-gather fallback
    out3 = jax.block_until_ready(out3)
    ref3, _, _ = _reference(x3, y3, idx3, memory, K=K3, T=T, Z=-1.0,
                            momentum=momentum, use_softmax=False)
    assert out3.shape == (batch3, K3 + 1)
    assert jnp.allclose(out3, ref3, rtol=1e-4, atol=1e-10)

    print("KERNEL_OK")
</pallas_src>

<mosaic_0001>
module attributes {stable_mosaic.version = 11 : i64} {
  func.func @_fused_kernel(%arg0: i32, %arg1: memref<32x100xf32, #tpu.memory_space<vmem>>, %arg2: memref<4x7xi32, #tpu.memory_space<vmem>>, %arg3: memref<4x32xf32, #tpu.memory_space<vmem>>, %arg4: memref<4x7xf32, #tpu.memory_space<vmem>>) attributes {dimension_semantics = [#tpu.dimension_semantics<parallel>], iteration_bounds = array<i64: 1>, scalar_prefetch = 0 : i64, scratch_operands = 0 : i64, tpu.core_type = #tpu.core_type<tc>, window_params = [{pipeline_mode = #tpu.pipeline_mode<synchronous>, transform_indices = @transform_0, window_bounds = array<i64: 32, 100>}, {transform_indices = @transform_1, window_bounds = array<i64: 4, 7>}, {transform_indices = @transform_2, window_bounds = array<i64: 4, 32>}, {transform_indices = @transform_3, window_bounds = array<i64: 4, 7>}]} {
    %c0 = arith.constant 0 : index
    %c0_0 = arith.constant 0 : index
    %0 = vector.load %arg3[%c0, %c0_0] : memref<4x32xf32, #tpu.memory_space<vmem>>, vector<4x32xf32>
    %c0_1 = arith.constant 0 : index
    %c0_2 = arith.constant 0 : index
    %1 = vector.load %arg1[%c0_1, %c0_2] : memref<32x100xf32, #tpu.memory_space<vmem>>, vector<32x100xf32>
    %c0_3 = arith.constant 0 : index
    %c0_4 = arith.constant 0 : index
    %2 = vector.load %arg2[%c0_3, %c0_4] : memref<4x7xi32, #tpu.memory_space<vmem>>, vector<4x7xi32>
    %cst = arith.constant dense<0.000000e+00> : vector<4x100xf32>
    %3 = tpu.matmul %0, %1, %cst {dimension_numbers = #tpu.dot_dimension_numbers<[1], [0], [0], [1], [0, 0, 1, 1], [], []>, precision = #tpu.contract_precision<fp32>} : vector<4x32xf32>, vector<32x100xf32>, vector<4x100xf32> -> vector<4x100xf32>
    %4 = tpu.iota {dimensions = array<i32: 2>} : vector<4x7x100xi32>
    %5 = vector.shape_cast %2 : vector<4x7xi32> to vector<4x7x1xi32>
    %6 = vector.broadcast %5 : vector<4x7x1xi32> to vector<4x7x100xi32>
    %7 = arith.cmpi eq, %4, %6 : vector<4x7x100xi32>
    %8 = vector.shape_cast %3 : vector<4x100xf32> to vector<4x1x100xf32>
    %cst_5 = arith.constant 0.000000e+00 : f32
    %9 = vector.shape_cast %8 : vector<4x1x100xf32> to vector<4x1x100xf32>
    %10 = vector.broadcast %9 : vector<4x1x100xf32> to vector<4x7x100xf32>
    %11 = vector.broadcast %cst_5 : f32 to vector<4x7x100xf32>
    %12 = arith.select %7, %10, %11 : vector<4x7x100xi1>, vector<4x7x100xf32>
    %cst_6 = arith.constant dense<0.000000e+00> : vector<4x7xf32>
    %13 = vector.multi_reduction <add>, %12, %cst_6 [2] : vector<4x7x100xf32> to vector<4x7xf32>
    %cst_7 = arith.constant 14.2857141 : f32
    %14 = vector.broadcast %cst_7 : f32 to vector<4x7xf32>
    %15 = arith.mulf %13, %14 : vector<4x7xf32>
    %16 = math.exp %15 : vector<4x7xf32>
    %c0_8 = arith.constant 0 : index
    %c0_9 = arith.constant 0 : index
    %17 = vector.load %arg4[%c0_8, %c0_9] : memref<4x7xf32, #tpu.memory_space<vmem>>, vector<4x7xf32>
    tpu.vector_store %arg4[%c0_8, %c0_9], %16 {strides = array<i32>} : memref<4x7xf32, #tpu.memory_space<vmem>>, vector<4x7xf32>,
    return
  }
  func.func @transform_0(%arg0: i32) -> (i32, i32) {
    %c0_i32 = arith.constant 0 : i32
    %c0_i32_0 = arith.constant 0 : i32
    %c0_i32_1 = arith.constant 0 : i32
    return %c0_i32, %c0_i32_0 : i32, i32
  }
  func.func @transform_1(%arg0: i32) -> (i32, i32) {
    %c0_i32 = arith.constant 0 : i32
    %c0_i32_0 = arith.constant 0 : i32
    return %arg0, %c0_i32 : i32, i32
  }
  func.func @transform_2(%arg0: i32) -> (i32, i32) {
    %c0_i32 = arith.constant 0 : i32
    %c0_i32_0 = arith.constant 0 : i32
    return %arg0, %c0_i32 : i32, i32
  }
  func.func @transform_3(%arg0: i32) -> (i32, i32) {
    %c0_i32 = arith.constant 0 : i32
    %c0_i32_0 = arith.constant 0 : i32
    return %arg0, %c0_i32 : i32, i32
  }
}

</mosaic_0001>

<bundles_post_ra>
// kernel: tpu_custom_call.1
= control target key start
LH: loop header
LB: loop body
LE: loop exit
PB: predicated region body
PF: predicated region fallthrough
CT: control target
= control target key end

     0   :  { %8 = vsyncpa [#allocation3], 0  ;;  %s1042_s0 = inlined_call_operand.hbm [shape: f32[32,100], index: 0, kind: input, shape index: {}]   ;;  %s1043_s1 = inlined_call_operand.hbm [shape: s32[4,7], index: 1, kind: input, shape index: {}]   ;;  %s1044_s2 = inlined_call_operand.vmem [shape: f32[4,32], index: 2, kind: input, shape index: {}]   ;;  %s1045_s3 = inlined_call_operand.hbm [shape: f32[4,7], index: 3, kind: output, shape index: {}]  }
   0x1   :  { %9 = vsyncpa [#allocation6], 0 }
   0x2   :  { %10 = vsyncpa [#allocation4], 0  ;;  %s919_s12 = smov [#allocation2]   ;;  %s847_s16 = scalar_lea.hbm %s1042_s0, 512 }
   0x3   :  { %s16_s13 = sshll.u32 %s919_s12, 4  ;;  %p848_p0 = scmp.ne.s32.totalorder %s1042_s0, %s847_s16  ;;  %s17_s13 = int_to_ptr.vmem [resolvable:$true] %s16_s13 }
   0x4   :  { %p851_p1 = scmp.lt.u32.totalorder %s847_s16, %s1042_s0 }
   0x6   :  { %p853_p2 = pnand %p851_p1, %p848_p0 }
   0x8   :  { %856 = shalt.err (!%p853_p2)
}
   0x9   :  { %s857_s21 = scalar_lea.vmem %s17_s13, 512  ;;  %p862_p4 = scmp.lt.s32.totalorder %s17_s13, %s17_s13 }
   0xa   :  { %p858_p3 = scmp.ne.s32.totalorder %s17_s13, %s857_s21  ;;  %p863_p5 = scmp.lt.s32.totalorder %s857_s21, %s857_s21 }
   0xc   :  { %p864_p6 = por %p863_p5, %p862_p4 }
   0xe   :  { %p865_p7 = pnand %p864_p6, %p858_p3 }
  0x10   :  { %868 = shalt.err (!%p865_p7)
}
  0x11   :  { %s920_s22 = smov 128   ;;  %s921_s23 = smov 8  }
  0x12   :  { %22 = dma.hbm_to_vmem [thread:$0]  %s1042_s0, 512, %s17_s13, [#allocation3], %s920_s22, %s920_s22, %s921_s23  }
  0x13   :  { %s922_s26 = smov [#allocation5]   ;;  %s869_s30 = scalar_lea.hbm %s1043_s1, 64 }
  0x14   :  { %s29_s27 = sshll.u32 %s922_s26, 4  ;;  %p870_p8 = scmp.ne.s32.totalorder %s1043_s1, %s869_s30  ;;  %s30_s27 = int_to_ptr.vmem [resolvable:$true] %s29_s27 }
  0x15   :  { %p873_p9 = scmp.lt.u32.totalorder %s869_s30, %s1043_s1 }
  0x17   :  { %p875_p10 = pnand %p873_p9, %p870_p8 }
  0x19   :  { %878 = shalt.err (!%p875_p10)
}
  0x1a   :  { %s879_s8 = scalar_lea.vmem %s30_s27, 64  ;;  %p884_p12 = scmp.lt.s32.totalorder %s30_s27, %s30_s27 }
  0x1b   :  { %p880_p11 = scmp.ne.s32.totalorder %s30_s27, %s879_s8  ;;  %p885_p13 = scmp.lt.s32.totalorder %s879_s8, %s879_s8 }
  0x1d   :  { %p886_p0 = por %p885_p13, %p884_p12 }
  0x1f   :  { %p887_p1 = pnand %p886_p0, %p880_p11 }
  0x21   :  { %890 = shalt.err (!%p887_p1)
}
  0x22   :  { %32 = dma.hbm_to_vmem [thread:$0]  %s1043_s1, 64, %s30_s27, [#allocation6]  }
  0x23   :  { %913 = dma.done.wait [#allocation3], 512  }
  0x24   :  { %914 = vsyncadd [#allocation3], 4294966784 }
  0x25   :  { %915 = dma.done.wait [#allocation6], 64  }
  0x26   :  { %916 = vsyncadd [#allocation6], 4294967232  ;;  %v923_v0 = vmov 0.0|0.0   ;;  %v536_v1 = vlaneseq  ;;  %vm924_vm0 = vmmov 0   ;;  %v925_v2 = vmov 0.0   ;;  %v42_v4 = vld [vmem:[#allocation2] sm:$0xff] }
  0x27   :  { %785 = vmatprep.subr.bf16.mxu1 %v923_v0  ;;  %803 = vmatprep.subr.bf16.mxu0 %v923_v0  ;;  %vm47_vm1 = vcmask 261120   ;;  %v43_v5 = vld [vmem:[#allocation2 + $0x8] sm:$0xff]  ;;  %v44_v6 = vld [vmem:[#allocation2 + $0x10] sm:$0xff]  ;;  %v52_v8 = vand.u32 4294901760, %v42_v4  ;;  %v45_v10 = vld [vmem:[#allocation2 + $0x18] sm:$0xff]  ;;  %vm619_vm3 = vcmask 817152  }
  0x28   :  { %727 = vmatprep.mubr.msk.f32.mxu1 %vm924_vm0, %v925_v2  ;;  %760 = vmatprep.mubr.msk.f32.mxu0 %vm924_vm0, %v925_v2  ;;  %v979_v3 = vshrl.u32 %v536_v1, 7  ;;  %v55_v9 = vand.u32 4294901760, %v43_v5  ;;  %v58_v11 = vand.u32 4294901760, %v44_v6  ;;  %v41_v12 = vld [vmem:[%s1044_s2] sm:$0xf]  ;;  %v61_v13 = vand.u32 4294901760, %v45_v10 }
  0x29   :  { %v49_v14 = vsel %vm47_vm1, %v41_v12, 0  ;;  %v46_v15 = vld [vmem:[#allocation5] sm:$0xf]  ;;  %v132_v19 = vsub.f32 %v42_v4, %v52_v8  ;;  %v926_v52 = vmov 1966171168   ;;  %v537_v62 = vand.u32 127, %v536_v1 }
  0x2a   :  { %v982_v7 = vsub.s32 0, %v979_v3  ;;  %v554_v16 = vsub.s32 2, %v979_v3  ;;  %v547_v17 = vsub.s32 1, %v979_v3  ;;  %v786_v18 = vpack.c.bf16 %v55_v9, %v52_v8  ;;  %s927_s2 = smov [#allocation7]  }
  0x2b   :  { %v139_v20 = vsub.f32 %v43_v5, %v55_v9  ;;  %v989_v21 = vsub.f32 %v44_v6, %v58_v11  ;;  %v991_v22 = vsub.f32 %v45_v10, %v61_v13  ;;  %v120_v23 = vand.u32 4294901760, %v49_v14  ;;  %s679_s11 = sshll.u32 %s927_s2, 4  ;;  %s680_s11 = int_to_ptr.vmem [resolvable:$true] %s679_s11 }
  0x2c   :  { %v541_v24 = vrot.slane %v46_v15, %v982_v7  ;;  %v561_v25 = vsub.s32 3, %v979_v3  ;;  %787 = vmatpush3.bf16.msra.mxu1 %v786_v18  ;;  %805 = vmatpush3.bf16.msra.mxu0 %v786_v18  ;;  %v789_v26 = vpack.c.bf16 %v61_v13, %v58_v11  ;;  %v133_v27 = vand.u32 4294901760, %v132_v19  ;;  %s891_s12 = scalar_lea.vmem %s680_s11, 64  ;;  %p896_p3 = scmp.lt.s32.totalorder %s680_s11, %s680_s11 }
  0x2d   :  { %v140_v28 = vand.u32 4294901760, %v139_v20  ;;  %v147_v29 = vand.u32 4294901760, %v989_v21  ;;  %788 = vmatprep.subr.bf16.mxu1 %v923_v0  ;;  %806 = vmatprep.subr.bf16.mxu0 %v923_v0  ;;  %v121_v30 = vsub.f32 %v49_v14, %v120_v23  ;;  %v154_v31 = vand.u32 4294901760, %v991_v22  ;;  %p892_p2 = scmp.ne.s32.totalorder %s680_s11, %s891_s12  ;;  %p897_p4 = scmp.lt.s32.totalorder %s891_s12, %s891_s12 }
  0x2e   :  { %v555_v32 = vrot.slane %v46_v15, %v554_v16  ;;  %v134_v33 = vsub.f32 %v132_v19, %v133_v27  ;;  %543 = vbcast.lane.b32.xlu0 %v541_v24, 256  ;;  %v548_v38 = vrot.slane %v46_v15, %v547_v17  ;;  %v562_v42 = vrot.slane %v46_v15, %v561_v25 }
  0x2f   :  { %v141_v34 = vsub.f32 %v139_v20, %v140_v28  ;;  %v148_v35 = vsub.f32 %v989_v21, %v147_v29  ;;  %v122_v36 = vand.u32 4294901760, %v121_v30  ;;  %v155_v37 = vsub.f32 %v991_v22, %v154_v31  ;;  %p898_p5 = por %p897_p4, %p896_p3 }
  0x30   :  { %557 = vbcast.lane.b32.xlu1 %v555_v32, 256  ;;  %790 = vmatpush3.bf16.msra.mxu1 %v789_v26  ;;  %v135_v39 = vand.u32 4294901760, %v134_v33  ;;  %v810_v41 = vpack.c.bf16 %v140_v28, %v133_v27  ;;  %v813_v48 = vpack.c.bf16 %v154_v31, %v147_v29  ;;  %v798_v50 = vpack.c.bf16 %v139_v20, %v132_v19 }
  0x31   :  { %808 = vmatpush3.bf16.msra.mxu0 %v789_v26  ;;  %v142_v40 = vand.u32 4294901760, %v141_v34  ;;  %v123_v43 = vsub.f32 %v121_v30, %v122_v36  ;;  %791 = vmatprep.subr.bf16.mxu1 %v923_v0  ;;  %v149_v45 = vand.u32 4294901760, %v148_v35  ;;  %v156_v46 = vand.u32 4294901760, %v155_v37  ;;  %p899_p6 = pnand %p898_p5, %p892_p2 }
  0x32   :  { %809 = vmatprep.subr.bf16.mxu0 %v923_v0  ;;  %550 = vbcast.lane.b32.xlu0 %v548_v38, 256  ;;  %v801_v51 = vpack.c.bf16 %v991_v22, %v989_v21  ;;  %v572_v53 = vunpack.c.l.s4 %v926_v52  ;;  %v650_v34 = vsub.s32 %v537_v62, %v979_v3  ;;  %vm664_vm7 = vcmask 1041409  }
  0x33   :  { %v792_v44 = vpack.c.bf16 %v142_v40, %v135_v39  ;;  %v124_v47 = vand.u32 4294901760, %v123_v43  ;;  %v795_v49 = vpack.c.bf16 %v156_v46, %v149_v45  ;;  %vm666_vm8 = vcmask 1042434  }
  0x34   :  { %761 = vmatmul.mubr.f32.vlgmr.msra.gmra.mrb[0].mxu0 %v122_v36  ;;  %564 = vbcast.lane.b32.xlu1 %v562_v42, 256  ;;  %v573_v54 = vunpack.c.0.s8 %v572_v53  ;;  %vm668_vm9 = vcmask 1043459   ;;  %vm671_vm10 = vcmask 52224  }
  0x35   :  { %811 = vmatpush3.bf16.msra.mxu0 %v810_v41  ;;  %771 = vmatprep.mubr.msk.f32.mxu0 %vm924_vm0, %v925_v2 }
  0x36   :  { %728 = vmatmul.mubr.f32.vlgmr.msra.gmra.mrb[0].mxu1 %v124_v47  ;;  %812 = vmatprep.subr.bf16.mxu0 %v923_v0  ;;  %v576_v56 = vsub.s32 %v573_v54, %v979_v3 }
  0x37   :  { %793 = vmatpush3.bf16.msra.mxu1 %v792_v44  ;;  %738 = vmatprep.mubr.msk.f32.mxu1 %vm924_vm0, %v925_v2 }
  0x38   :  { %794 = vmatprep.subr.bf16.mxu1 %v923_v0 }
  0x39   :  { %814 = vmatpush3.bf16.msra.mxu0 %v813_v48 }
  0x3a   :  { %815 = vmatprep.subr.bf16.mxu0 %v923_v0 }
  0x3b   :  { %796 = vmatpush3.bf16.msra.mxu1 %v795_v49 }
  0x3c   :  { %797 = vmatprep.subr.bf16.mxu1 %v923_v0  ;;  %772 = vmatmul.mubr.f32.vlgmr.msra.gmra.mrb[0].mxu0 %v120_v23 }
  0x3d   :  { %817 = vmatpush3.bf16.msra.mxu0 %v786_v18  ;;  %782 = vmatprep.mubr.msk.f32.mxu0 %vm924_vm0, %v925_v2 }
  0x3e   :  { %739 = vmatmul.mubr.f32.vlgmr.msra.gmra.mrb[0].mxu1 %v120_v23  ;;  %818 = vmatprep.subr.bf16.mxu0 %v923_v0 }
  0x3f   :  { %799 = vmatpush3.bf16.msra.mxu1 %v798_v50  ;;  %749 = vmatprep.mubr.msk.f32.mxu1 %vm924_vm0, %v925_v2 }
  0x40   :  { %800 = vmatprep.subr.bf16.mxu1 %v923_v0 }
  0x41   :  { %820 = vmatpush3.bf16.msra.mxu0 %v789_v26 }
  0x43   :  { %802 = vmatpush3.bf16.msra.mxu1 %v801_v51 }
  0x44   :  { %783 = vmatmul.mubr.f32.vlgmr.msra.gmra.mrb[0].mxu0 %v120_v23 }
  0x46   :  { %750 = vmatmul.mubr.f32.vlgmr.msra.gmra.mrb[0].mxu1 %v121_v30 }
  0xa0   :  { %v544_v58 = vpop.permute.xlu0 %543 }
  0xa1   :  { %vm566_vm2 = vcmp.eq.s32.totalorder %v537_v62, %v544_v58 }
  0xa2   :  { %v558_v2 = vpop.permute.xlu1 %557 }
  0xa3   :  { %vm568_vm4 = vcmp.eq.s32.totalorder %v537_v62, %v558_v2 }
  0xa4   :  { %v551_v5 = vpop.permute.xlu0 %550 }
  0xa5   :  { %vm567_vm5 = vcmp.eq.s32.totalorder %v537_v62, %v551_v5 }
  0xa6   :  { %v565_v10 = vpop.permute.xlu1 %564 }
  0xa7   :  { %vm569_vm6 = vcmp.eq.s32.totalorder %v537_v62, %v565_v10 }
 0x117   :  { %v532_v55 = vpop.f32.mrb[0].mxu0 }
 0x118   :  { %v784_v57 = vpop.f32.mrb[1].mxu0 }
 0x119   :  { %v297_v59 = vpop.f32.mrb[0].mxu1 }
 0x11a   :  { %v821_v60 = vadd.f32 %v532_v55, %v297_v59  ;;  %v751_v61 = vpop.f32.mrb[1].mxu1 }
 0x11c   :  { %v577_v63 = vrot.slane %v821_v60, %v576_v56 }
 0x11e   :  { %v578_v0 = vcombine.high %v577_v63, %v577_v63  ;;  %v585_v4 = vrot.slane %v577_v63, %v576_v56 }
 0x120   :  { %v598_v6 = vrot.slane %v585_v4, %v982_v7  ;;  %v592_v8 = vrot.slane %v578_v0, %v576_v56  ;;  %v593_v9 = vcombine.high %v585_v4, %v585_v4 }
 0x122   :  { %v615_v11 = vsel %vm566_vm2, %v598_v6, 0.0  ;;  %v602_v12 = vrot.slane %v592_v8, %v982_v7  ;;  %v606_v13 = vrot.slane %v593_v9, %v982_v7  ;;  %v594_v1 = vcombine.high %v592_v8, %v592_v8 }
 0x123   :  { %v620_v14 = vsel %vm619_vm3, %v615_v11, 0.0 }
 0x124   :  { %621 = vadd.xlane.f32.xlu0 %v620_v14  ;;  %v616_v15 = vsel %vm567_vm5, %v602_v12, 0.0  ;;  %v617_v16 = vsel %vm568_vm4, %v606_v13, 0.0  ;;  %v610_v17 = vrot.slane %v594_v1, %v982_v7 }
 0x125   :  { %v623_v18 = vsel %vm619_vm3, %v616_v15, 0.0  ;;  %v626_v19 = vsel %vm619_vm3, %v617_v16, 0.0 }
 0x126   :  { %624 = vadd.xlane.f32.xlu1 %v623_v18  ;;  %v618_v20 = vsel %vm569_vm6, %v610_v17, 0.0 }
 0x127   :  { %v629_v21 = vsel %vm619_vm3, %v618_v20, 0.0 }
 0x128   :  { %627 = vadd.xlane.f32.xlu0 %v626_v19 }
 0x12c   :  { %630 = vadd.xlane.f32.xlu0 %v629_v21 }
 0x1b1   :  { %v622_v22 = vpop.xlane.xlu0 %621 }
 0x1b2   :  { %v632_v23 = vmul.f32 14.285714, %v622_v22 }
 0x1b3   :  { %v625_v24 = vpop.xlane.xlu1 %624 }
 0x1b4   :  { %v636_v25 = vmul.f32 1.442695, %v632_v23  ;;  %v633_v26 = vmul.f32 14.285714, %v625_v24 }
 0x1b5   :  { %v628_v27 = vpop.xlane.xlu0 %627 }
 0x1b6   :  { %v638_v28 = vmul.f32 1.442695, %v633_v26  ;;  %v634_v29 = vmul.f32 14.285714, %v628_v27  ;;  %839 = vpow2.f32 %v636_v25 }
 0x1b8   :  { %841 = vpow2.f32 %v638_v28  ;;  %v640_v7 = vmul.f32 1.442695, %v634_v29 }
 0x1b9   :  { %v631_v30 = vpop.xlane.xlu0 %630 }
 0x1ba   :  { %843 = vpow2.f32 %v640_v7  ;;  %v635_v31 = vmul.f32 14.285714, %v631_v30 }
 0x1bc   :  { %v642_v32 = vmul.f32 1.442695, %v635_v31 }
 0x1be   :  { %845 = vpow2.f32 %v642_v32 }
 0x1c0   :  { %v840_v33 = vpop.eup %839 }
 0x1c1   :  { %v651_v38 = vrot.slane %v840_v33, %v650_v34 }
 0x1c2   :  { %v842_v35 = vpop.eup %841 }
 0x1c3   :  { %v655_v36 = vrot.slane %v842_v35, %v650_v34 }
 0x1c4   :  { %v844_v37 = vpop.eup %843 }
 0x1c5   :  { %v659_v39 = vrot.slane %v844_v37, %v650_v34  ;;  %v665_v40 = vsel %vm664_vm7, %v655_v36, %v651_v38 }
 0x1c7   :  { %v667_v43 = vsel %vm666_vm8, %v659_v39, %v665_v40 }
 0x1c8   :  { %v846_v41 = vpop.eup %845 }
 0x1c9   :  { %v663_v42 = vrot.slane %v846_v41, %v650_v34 }
 0x1cb   :  { %v669_v44 = vsel %vm668_vm9, %v663_v42, %v667_v43 }
 0x1cc   :  { %672 = vst.msk [vmem:[#allocation7] sm:$0xf] %vm671_vm10, %v669_v44 }
 0x1cd   :  { %902 = shalt.err (!%p899_p6)
}
 0x1ce   :  { %s903_s15 = scalar_lea.hbm %s1045_s3, 64 }
 0x1cf   :  { %p904_p7 = scmp.ne.s32.totalorder %s1045_s3, %s903_s15  ;;  %p907_p8 = scmp.lt.u32.totalorder %s903_s15, %s1045_s3 }
 0x1d1   :  { %p909_p9 = pnand %p907_p8, %p904_p7 }
 0x1d3   :  { %912 = shalt.err (!%p909_p9)
}
 0x1d4   :  { %682 = dma.vmem_to_hbm [thread:$0]  %s680_s11, 64, %s1045_s3, [#allocation4]  }
 0x1d5   :  { %917 = dma.done.wait [#allocation4], 64  }
 0x1d6   :  { %918 = vsyncadd [#allocation4], 4294967232 }
 0x1d7   :  { %686 = vsyncpa [#allocation3], 1 }
 0x1d8   :  { %687 = vsyncpa [#allocation6], 1 }
 0x1d9   :  { %688 = vsyncpa [#allocation4], 1 }

</bundles_post_ra>
